<compile_context>
chip_gen: v7x
topology: tpu7x:2x2x1
jax: 0.10.0
libtpu: 0.0.40
codegen_flags: <defaults>
</compile_context>

<pallas_src>
import functools

import jax
import jax.numpy as jnp
from jax import lax
from jax.experimental import pallas as pl
from jax.experimental.pallas import tpu as pltpu


def _sq_diff_partial_kernel(xhat_ref, x_ref, out_ref, acc_ref, *,
                            rows, tile_rows, tiles_per_core, needs_mask):
    """Streams (tile_rows, lane) blocks and accumulates sum((Xhat - X)^2).

    Grid is (num_cores, tiles_per_core): axis 0 is "parallel" (megacore split
    on v7x), axis 1 is the "arbitrary" streaming/accumulation axis.  Each core
    owns a contiguous chunk of row-tiles and writes one f32 partial sum.
    """
    c = pl.program_id(0)
    i = pl.program_id(1)

    @pl.when(i == 0)
    def _init():
        acc_ref[...] = jnp.zeros_like(acc_ref)

    d = xhat_ref[...].astype(jnp.float32) - x_ref[...].astype(jnp.float32)
    sq = d * d

    if needs_mask:
        # Mask rows outside [0, rows): covers (a) the ragged last tile when
        # rows % tile_rows != 0 and (b) duplicated, index-clamped tiles given
        # to the last core when num_tiles is not a multiple of num_cores.
        row_start = (c * tiles_per_core + i) * tile_rows
        valid = rows - row_start                          # traced int scalar
        row_ids = lax.broadcasted_iota(jnp.int32, (tile_rows, 1), 0)
        sq = jnp.where(row_ids < valid, sq, 0.0)

    # Lane-wide f32 accumulator strip; sublane reduce per step is cheap filler
    # under the HBM roofline and keeps scratch VMEM tiny.
    acc_ref[...] += jnp.sum(sq, axis=0, keepdims=True)

    @pl.when(i == tiles_per_core - 1)
    def _finalize():
        out_ref[0, 0] = jnp.sum(acc_ref[...])


def vae_loss(xhat, x, mu, log_var, *, max_lane=1024, max_tile_rows=1024,
             num_cores=2):
    """Pallas implementation of VAELoss.forward((Xhat, mu, log_var), X)."""
    assert xhat.shape == x.shape
    assert mu.shape == log_var.shape
    assert max_tile_rows % 8 == 0 and max_tile_rows >= 8

    n_rec = int(xhat.size)
    itemsize = jnp.dtype(xhat.dtype).itemsize

    # ---- Reconstruction tensors -> lane-dense 2-D slab, NO padding in the
    # common case: pick the largest lane width (multiple of 128, <= max_lane)
    # that divides n_rec so the reshape is free.
    max_lane = max(128, (int(max_lane) // 128) * 128)
    lane = None
    for cand in range(max_lane, 0, -128):
        if n_rec % cand == 0:
            lane = cand
            break

    if lane is not None:
        xhat2 = xhat.reshape(-1, lane)
        x2 = x.reshape(-1, lane)
        rows = n_rec // lane
    else:
        # Rare fallback (n_rec not a multiple of 128): minimal zero-pad.  Both
        # operands get the identical pad, so the padded diff is exactly 0.
        # This costs one extra HBM copy of each reconstruction tensor.
        lane = 128
        pad = (-n_rec) % lane
        xhat2 = jnp.pad(xhat.reshape(-1), (0, pad)).reshape(-1, lane)
        x2 = jnp.pad(x.reshape(-1), (0, pad)).reshape(-1, lane)
        rows = (n_rec + pad) // lane

    # ---- Tile selection.
    if rows <= max_tile_rows:
        tile_rows = rows                      # single block == full array dims
    else:
        tile_rows = max_tile_rows
        # Keep the double-buffered streaming working set (2 inputs x 2 bufs)
        # well under v7x's 64 MiB physical VMEM / the 48 MiB scoped request.
        while tile_rows > 8 and 4 * tile_rows * lane * itemsize > (36 << 20):
            tile_rows = max(8, ((tile_rows // 2) // 8) * 8)
    num_tiles = pl.cdiv(rows, tile_rows)

    num_cores = max(1, min(int(num_cores), num_tiles))
    tiles_per_core = pl.cdiv(num_tiles, num_cores)
    needs_mask = (num_cores * tiles_per_core * tile_rows) != rows

    def rec_map(c, i):
        # Clamp so duplicated tiles on the last core stay in bounds; their
        # contribution is zeroed by the in-kernel row mask.
        return (jnp.minimum(c * tiles_per_core + i, num_tiles - 1), 0)

    kernel = functools.partial(
        _sq_diff_partial_kernel,
        rows=rows, tile_rows=tile_rows, tiles_per_core=tiles_per_core,
        needs_mask=needs_mask)

    tile_bytes = tile_rows * lane * itemsize
    vmem_need = 4 * tile_bytes + 4 * lane + (1 << 16)
    vmem_limit = int(min(48 << 20, max(32 << 20, 2 * vmem_need)))

    partials = pl.pallas_call(
        kernel,
        out_shape=jax.ShapeDtypeStruct((num_cores, 1), jnp.float32),
        grid_spec=pltpu.PrefetchScalarGridSpec(
            num_scalar_prefetch=0,
            grid=(num_cores, tiles_per_core),
            in_specs=[
                pl.BlockSpec((tile_rows, lane), rec_map),
                pl.BlockSpec((tile_rows, lane), rec_map),
            ],
            out_specs=pl.BlockSpec((1, 1), lambda c, i: (c, 0),
                                   memory_space=pltpu.SMEM),
            scratch_shapes=[pltpu.VMEM((1, lane), jnp.float32)],
        ),
        compiler_params=pltpu.CompilerParams(
            dimension_semantics=("parallel", "arbitrary"),
            vmem_limit_bytes=vmem_limit),
        cost_estimate=pl.CostEstimate(
            flops=3 * n_rec,
            transcendentals=0,
            bytes_accessed=int(2 * n_rec * itemsize + num_cores * 4)),
    )(xhat2, x2)

    rec = jnp.sum(partials) / jnp.float32(n_rec)

    # KL term on the tiny (B, Z) latents: computed in the JAX wrapper (fused
    # by XLA for free); keeps the streaming kernel free of extra DMAs / exp.
    mu32 = mu.astype(jnp.float32)
    lv32 = log_var.astype(jnp.float32)
    kl = -0.5 * jnp.mean(1.0 + lv32 - mu32 * mu32 - jnp.exp(lv32))
    return rec + kl


def vae_loss_ref(xhat, x, mu, log_var):
    """Pure-JAX reference (mirrors the PyTorch module exactly)."""
    kl = -0.5 * jnp.mean(1.0 + log_var - mu * mu - jnp.exp(log_var))
    rec = jnp.mean((xhat - x) ** 2)
    return rec + kl


if __name__ == "__main__":
    key = jax.random.PRNGKey(0)
    k1, k2, k3, k4 = jax.random.split(key, 4)

    B, C, H, W = 2, 4, 16, 16   # image-like reconstruction tensors (NCHW)
    Z = 32                      # latent dim

    X = jax.random.normal(k1, (B, C, H, W), dtype=jnp.float32)
    Xhat = jax.random.normal(k2, (B, C, H, W), dtype=jnp.float32)
    mu = jax.random.normal(k3, (B, Z), dtype=jnp.float32)
    log_var = 0.1 * jax.random.normal(k4, (B, Z), dtype=jnp.float32)

    # 1) Default tiling: single full-array block, no pad, no mask.
    ref = vae_loss_ref(Xhat, X, mu, log_var)
    loss = jax.block_until_ready(vae_loss(Xhat, X, mu, log_var))
    assert jnp.allclose(loss, ref, rtol=1e-5, atol=1e-5), (loss, ref)

    # 2) Multi-tile streaming + 2-way core split with an ODD tile count:
    #    exercises init/accumulate/finalize, the clamped duplicate tile on the
    #    second core, and multi-step accumulation on the first core.
    X3 = jax.random.normal(k1, (3, 4, 16, 16), dtype=jnp.float32)
    Xhat3 = jax.random.normal(k2, (3, 4, 16, 16), dtype=jnp.float32)
    ref3 = vae_loss_ref(Xhat3, X3, mu, log_var)
    loss3 = jax.block_until_ready(
        vae_loss(Xhat3, X3, mu, log_var, max_lane=128, max_tile_rows=8))
    assert jnp.allclose(loss3, ref3, rtol=1e-5, atol=1e-5), (loss3, ref3)

    # 3) Ragged last tile (rows % tile_rows != 0): exercises the in-kernel
    #    row mask on the genuinely partial final block.
    X4 = jax.random.normal(k3, (3, 4, 10, 16), dtype=jnp.float32)
    Xhat4 = jax.random.normal(k4, (3, 4, 10, 16), dtype=jnp.float32)
    ref4 = vae_loss_ref(Xhat4, X4, mu, log_var)
    loss4 = jax.block_until_ready(
        vae_loss(Xhat4, X4, mu, log_var, max_lane=128, max_tile_rows=8))
    assert jnp.allclose(loss4, ref4, rtol=1e-5, atol=1e-5), (loss4, ref4)

    # 4) numel not a multiple of 128: rare minimal-pad fallback path.
    X5 = jax.random.normal(k1, (2, 3, 5, 7), dtype=jnp.float32)
    Xhat5 = jax.random.normal(k2, (2, 3, 5, 7), dtype=jnp.float32)
    ref5 = vae_loss_ref(Xhat5, X5, mu, log_var)
    loss5 = jax.block_until_ready(vae_loss(Xhat5, X5, mu, log_var))
    assert jnp.allclose(loss5, ref5, rtol=1e-5, atol=1e-5), (loss5, ref5)

    print("KERNEL_OK")
</pallas_src>

<mosaic_0001>
module attributes {stable_mosaic.version = 11 : i64} {
  func.func @_sq_diff_partial_kernel(%arg0: i32, %arg1: i32, %arg2: memref<2x1024xf32, #tpu.memory_space<vmem>>, %arg3: memref<2x1024xf32, #tpu.memory_space<vmem>>, %arg4: memref<1x1xf32, #tpu.memory_space<smem>>, %arg5: memref<1x1024xf32, #tpu.memory_space<vmem>>) attributes {dimension_semantics = [#tpu.dimension_semantics<parallel>, #tpu.dimension_semantics<arbitrary>], iteration_bounds = array<i64: 1, 1>, scalar_prefetch = 0 : i64, scratch_operands = 1 : i64, tpu.core_type = #tpu.core_type<tc>, window_params = [{transform_indices = @transform_0, window_bounds = array<i64: 2, 1024>}, {transform_indices = @transform_1, window_bounds = array<i64: 2, 1024>}, {transform_indices = @transform_2, window_bounds = array<i64: 1, 1>}]} {
    %c0_i32 = arith.constant 0 : i32
    %0 = arith.cmpi eq, %arg1, %c0_i32 : i32
    %1 = arith.extui %0 : i1 to i32
    %c0_i32_0 = arith.constant 0 : i32
    %2 = arith.cmpi ne, %1, %c0_i32_0 : i32
    scf.if %2 {
      %cst_10 = arith.constant 0.000000e+00 : f32
      %15 = vector.broadcast %cst_10 : f32 to vector<1x1024xf32>
      %c0_11 = arith.constant 0 : index
      %c0_12 = arith.constant 0 : index
      %16 = vector.load %arg5[%c0_11, %c0_12] : memref<1x1024xf32, #tpu.memory_space<vmem>>, vector<1x1024xf32>
      tpu.vector_store %arg5[%c0_11, %c0_12], %15 {strides = array<i32>} : memref<1x1024xf32, #tpu.memory_space<vmem>>, vector<1x1024xf32>,
    } else {
    }
    %c0 = arith.constant 0 : index
    %c0_1 = arith.constant 0 : index
    %3 = vector.load %arg2[%c0, %c0_1] : memref<2x1024xf32, #tpu.memory_space<vmem>>, vector<2x1024xf32>
    %c0_2 = arith.constant 0 : index
    %c0_3 = arith.constant 0 : index
    %4 = vector.load %arg3[%c0_2, %c0_3] : memref<2x1024xf32, #tpu.memory_space<vmem>>, vector<2x1024xf32>
    %5 = arith.subf %3, %4 : vector<2x1024xf32>
    %6 = arith.mulf %5, %5 : vector<2x1024xf32>
    %c0_4 = arith.constant 0 : index
    %c0_5 = arith.constant 0 : index
    %7 = vector.load %arg5[%c0_4, %c0_5] : memref<1x1024xf32, #tpu.memory_space<vmem>>, vector<1x1024xf32>
    %cst = arith.constant dense<0.000000e+00> : vector<1024xf32>
    %8 = vector.multi_reduction <add>, %6, %cst [0] : vector<2x1024xf32> to vector<1024xf32>
    %9 = vector.shape_cast %8 : vector<1024xf32> to vector<1x1024xf32>
    %10 = arith.addf %7, %9 : vector<1x1024xf32>
    %c0_6 = arith.constant 0 : index
    %c0_7 = arith.constant 0 : index
    %11 = vector.load %arg5[%c0_6, %c0_7] : memref<1x1024xf32, #tpu.memory_space<vmem>>, vector<1x1024xf32>
    tpu.vector_store %arg5[%c0_6, %c0_7], %10 {strides = array<i32>} : memref<1x1024xf32, #tpu.memory_space<vmem>>, vector<1x1024xf32>,
    %c0_i32_8 = arith.constant 0 : i32
    %12 = arith.cmpi eq, %arg1, %c0_i32_8 : i32
    %13 = arith.extui %12 : i1 to i32
    %c0_i32_9 = arith.constant 0 : i32
    %14 = arith.cmpi ne, %13, %c0_i32_9 : i32
    scf.if %14 {
      %c0_10 = arith.constant 0 : index
      %c0_11 = arith.constant 0 : index
      %15 = vector.load %arg5[%c0_10, %c0_11] : memref<1x1024xf32, #tpu.memory_space<vmem>>, vector<1x1024xf32>
      %16 = vector.shape_cast %15 : vector<1x1024xf32> to vector<1x1x1024xf32>
      %cst_12 = arith.constant dense<0.000000e+00> : vector<1xf32>
      %17 = vector.multi_reduction <add>, %16, %cst_12 [1, 2] : vector<1x1x1024xf32> to vector<1xf32>
      %18 = vector.shape_cast %17 : vector<1xf32> to vector<1x1x1xf32>
      %19 = vector.extract %18[0, 0, 0] : f32 from vector<1x1x1xf32>
      %c0_13 = arith.constant 0 : index
      %c0_14 = arith.constant 0 : index
      %20 = memref.load %arg4[%c0_13, %c0_14] : memref<1x1xf32, #tpu.memory_space<smem>>
      memref.store %19, %arg4[%c0_13, %c0_14] : memref<1x1xf32, #tpu.memory_space<smem>>
    } else {
    }
    return
  }
  func.func @transform_0(%arg0: i32, %arg1: i32) -> (i32, i32) {
    %c1_i32 = arith.constant 1 : i32
    %0 = arith.muli %arg0, %c1_i32 : i32
    %1 = arith.addi %0, %arg1 : i32
    %c0_i32 = arith.constant 0 : i32
    %2 = arith.minsi %1, %c0_i32 : i32
    %c0_i32_0 = arith.constant 0 : i32
    %c0_i32_1 = arith.constant 0 : i32
    return %2, %c0_i32_0 : i32, i32
  }
  func.func @transform_1(%arg0: i32, %arg1: i32) -> (i32, i32) {
    %c1_i32 = arith.constant 1 : i32
    %0 = arith.muli %arg0, %c1_i32 : i32
    %1 = arith.addi %0, %arg1 : i32
    %c0_i32 = arith.constant 0 : i32
    %2 = arith.minsi %1, %c0_i32 : i32
    %c0_i32_0 = arith.constant 0 : i32
    %c0_i32_1 = arith.constant 0 : i32
    return %2, %c0_i32_0 : i32, i32
  }
  func.func @transform_2(%arg0: i32, %arg1: i32) -> (i32, i32) {
    %c0_i32 = arith.constant 0 : i32
    %c0_i32_0 = arith.constant 0 : i32
    return %arg0, %c0_i32 : i32, i32
  }
}

</mosaic_0001>

<bundles_post_ra>
// kernel: tpu_custom_call.1
= control target key start
LH: loop header
LB: loop body
LE: loop exit
PB: predicated region body
PF: predicated region fallthrough
CT: control target
= control target key end

     0   :  { %7 = vsyncpa [#allocation4], 0  ;;  %s471_s0 = inlined_call_operand.hbm [shape: f32[2,1024], index: 0, kind: input, shape index: {}]   ;;  %s472_s1 = inlined_call_operand.hbm [shape: f32[2,1024], index: 1, kind: input, shape index: {}]   ;;  %s473_s2 = inlined_call_operand.hbm [shape: f32[1,1], index: 2, kind: output, shape index: {}]  }
   0x1   :  { %8 = vsyncpa [#allocation7], 0 }
   0x2   :  { %9 = vsyncpa [#allocation5], 0  ;;  %s387_s9 = smov [#allocation3]   ;;  %s388_s11 = smov [#allocation6]  }
   0x3   :  { %s22_s10 = sshll.u32 %s387_s9, 4  ;;  %s38_s12 = sshll.u32 %s388_s11, 4  ;;  %s23_s10 = int_to_ptr.vmem [resolvable:$true] %s22_s10  ;;  %s39_s12 = int_to_ptr.vmem [resolvable:$true] %s38_s12 }
   0x4   :  { %s327_s15 = scalar_lea.hbm %s471_s0, 256 }
   0x5   :  { %p328_p0 = scmp.ne.s32.totalorder %s471_s0, %s327_s15  ;;  %p331_p1 = scmp.lt.u32.totalorder %s327_s15, %s471_s0 }
   0x7   :  { %p333_p2 = pnand %p331_p1, %p328_p0 }
   0x9   :  { %336 = shalt.err (!%p333_p2)
}
   0xa   :  { %s337_s20 = scalar_lea.vmem %s23_s10, 256  ;;  %p342_p4 = scmp.lt.s32.totalorder %s23_s10, %s23_s10 }
   0xb   :  { %p338_p3 = scmp.ne.s32.totalorder %s23_s10, %s337_s20  ;;  %p343_p5 = scmp.lt.s32.totalorder %s337_s20, %s337_s20 }
   0xd   :  { %p344_p6 = por %p343_p5, %p342_p4 }
   0xf   :  { %p345_p7 = pnand %p344_p6, %p338_p3 }
  0x11   :  { %348 = shalt.err (!%p345_p7)
}
  0x12   :  { %25 = dma.hbm_to_vmem [thread:$0]  %s471_s0, 256, %s23_s10, [#allocation4]  }
  0x13   :  { %s349_s25 = scalar_lea.hbm %s472_s1, 256 }
  0x14   :  { %p350_p8 = scmp.ne.s32.totalorder %s472_s1, %s349_s25  ;;  %p353_p9 = scmp.lt.u32.totalorder %s349_s25, %s472_s1 }
  0x16   :  { %p355_p10 = pnand %p353_p9, %p350_p8 }
  0x18   :  { %358 = shalt.err (!%p355_p10)
}
  0x19   :  { %s359_s30 = scalar_lea.vmem %s39_s12, 256  ;;  %p364_p12 = scmp.lt.s32.totalorder %s39_s12, %s39_s12 }
  0x1a   :  { %p360_p11 = scmp.ne.s32.totalorder %s39_s12, %s359_s30  ;;  %p365_p13 = scmp.lt.s32.totalorder %s359_s30, %s359_s30 }
  0x1c   :  { %p366_p0 = por %p365_p13, %p364_p12 }
  0x1e   :  { %p367_p1 = pnand %p366_p0, %p360_p11 }
  0x20   :  { %370 = shalt.err (!%p367_p1)
}
  0x21   :  { %41 = dma.hbm_to_vmem [thread:$0]  %s472_s1, 256, %s39_s12, [#allocation7]  }
  0x22   :  { %381 = dma.done.wait [#allocation4], 256  }
  0x23   :  { %382 = vsyncadd [#allocation4], 4294967040 }
  0x24   :  { %383 = dma.done.wait [#allocation7], 256  }
  0x25   :  { %384 = vsyncadd [#allocation7], 4294967040  ;;  %v74_v0 = vlaneseq  ;;  %v389_v1 = vmov 1983009808   ;;  %v59_v5 = vld [vmem:[#allocation3] sm:$0xff]  ;;  %v60_v6 = vld [vmem:[#allocation3 + $0x8] sm:$0xff] }
  0x26   :  { %v72_v2 = vunpack.c.l.s4 %v389_v1  ;;  %v61_v7 = vld [vmem:[#allocation6] sm:$0xff]  ;;  %v62_v8 = vld [vmem:[#allocation6 + $0x8] sm:$0xff]  ;;  %v390_v13 = vmov 1966171168   ;;  %vm112_vm0 = vcmask 1041408   ;;  %vm274_vm1 = vcmask 1040384  }
  0x27   :  { %v431_v4 = vshrl.u32 %v74_v0, 7  ;;  %v63_v9 = vsub.f32 %v59_v5, %v61_v7  ;;  %v64_v11 = vsub.f32 %v60_v6, %v62_v8  ;;  %v182_v14 = vunpack.c.l.s4 %v390_v13  ;;  %s371_s6 = scalar_lea.hbm %s473_s2, 16 }
  0x28   :  { %v73_v3 = vunpack.c.0.s8 %v72_v2  ;;  %p372_p2 = scmp.ne.s32.totalorder %s473_s2, %s371_s6  ;;  %p375_p3 = scmp.lt.u32.totalorder %s371_s6, %s473_s2 }
  0x29   :  { %v65_v12 = vmul.f32 %v63_v9, %v63_v9  ;;  %v66_v15 = vmul.f32 %v64_v11, %v64_v11  ;;  %v183_v23 = vunpack.c.0.s8 %v182_v14 }
  0x2a   :  { %v76_v10 = vsub.s32 %v73_v3, %v431_v4  ;;  %p377_p4 = pnand %p375_p3, %p372_p2 }
  0x2b   :  { %v70_v16 = vcombine.high %v65_v12, %v65_v12  ;;  %v87_v18 = vcombine.high %v66_v15, %v66_v15  ;;  %v186_v11 = vsub.s32 %v183_v23, %v431_v4 }
  0x2c   :  { %v77_v17 = vrot.slane %v65_v12, %v76_v10  ;;  %v94_v19 = vrot.slane %v66_v15, %v76_v10 }
  0x2d   :  { %v84_v20 = vrot.slane %v70_v16, %v76_v10  ;;  %v101_v24 = vrot.slane %v87_v18, %v76_v10 }
  0x2e   :  { %v85_v21 = vcombine.high %v77_v17, %v77_v17  ;;  %v113_v22 = vsel %vm112_vm0, %v77_v17, 0.0  ;;  %v102_v25 = vcombine.high %v94_v19, %v94_v19  ;;  %v141_v27 = vsel %vm112_vm0, %v94_v19, 0.0 }
  0x2f   :  { %v114_v26 = vrot.slane %v113_v22, 4  ;;  %v86_v28 = vcombine.high %v84_v20, %v84_v20  ;;  %v127_v30 = vsel %vm112_vm0, %v84_v20, 0.0  ;;  %v142_v31 = vrot.slane %v141_v27, 4 }
  0x30   :  { %v120_v29 = vsel %vm112_vm0, %v85_v21, 0.0  ;;  %v103_v32 = vcombine.high %v101_v24, %v101_v24  ;;  %v128_v35 = vrot.slane %v127_v30, 4  ;;  %v148_v38 = vsel %vm112_vm0, %v102_v25, 0.0 }
  0x31   :  { %v115_v33 = vadd.f32 %v114_v26, %v113_v22  ;;  %v121_v34 = vrot.slane %v120_v29, 4  ;;  %v134_v36 = vsel %vm112_vm0, %v86_v28, 0.0  ;;  %v143_v37 = vadd.f32 %v142_v31, %v141_v27 }
  0x32   :  { %v155_v39 = vsel %vm112_vm0, %v101_v24, 0.0  ;;  %v129_v42 = vadd.f32 %v128_v35, %v127_v30  ;;  %v135_v43 = vrot.slane %v134_v36, 4  ;;  %v149_v45 = vrot.slane %v148_v38, 4 }
  0x33   :  { %v116_v40 = vrot.slane %v115_v33, 2  ;;  %v122_v41 = vadd.f32 %v121_v34, %v120_v29  ;;  %v144_v44 = vrot.slane %v143_v37, 2  ;;  %v156_v46 = vrot.slane %v155_v39, 4 }
  0x34   :  { %v162_v47 = vsel %vm112_vm0, %v103_v32, 0.0  ;;  %v130_v50 = vrot.slane %v129_v42, 2  ;;  %v136_v51 = vadd.f32 %v135_v43, %v134_v36  ;;  %v150_v53 = vadd.f32 %v149_v45, %v148_v38 }
  0x35   :  { %v117_v48 = vadd.f32 %v116_v40, %v115_v33  ;;  %v123_v49 = vrot.slane %v122_v41, 2  ;;  %v145_v52 = vadd.f32 %v144_v44, %v143_v37  ;;  %v157_v54 = vadd.f32 %v156_v46, %v155_v39 }
  0x36   :  { %v163_v55 = vrot.slane %v162_v47, 4  ;;  %v131_v58 = vadd.f32 %v130_v50, %v129_v42  ;;  %v137_v59 = vrot.slane %v136_v51, 2  ;;  %v151_v61 = vrot.slane %v150_v53, 2 }
  0x37   :  { %v118_v56 = vrot.slane %v117_v48, 1  ;;  %v124_v57 = vadd.f32 %v123_v49, %v122_v41  ;;  %v146_v60 = vrot.slane %v145_v52, 1  ;;  %v158_v62 = vrot.slane %v157_v54, 2 }
  0x38   :  { %v164_v63 = vadd.f32 %v163_v55, %v162_v47  ;;  %v132_v2 = vrot.slane %v131_v58, 1  ;;  %v138_v3 = vadd.f32 %v137_v59, %v136_v51  ;;  %v152_v5 = vadd.f32 %v151_v61, %v150_v53 }
  0x39   :  { %v119_v0 = vadd.f32 %v118_v56, %v117_v48  ;;  %v125_v1 = vrot.slane %v124_v57, 1  ;;  %v159_v6 = vadd.f32 %v158_v62, %v157_v54  ;;  %v147_v12 = vadd.f32 %v146_v60, %v145_v52 }
  0x3a   :  { %v165_v7 = vrot.slane %v164_v63, 2  ;;  %v133_v9 = vadd.f32 %v132_v2, %v131_v58  ;;  %v139_v10 = vrot.slane %v138_v3, 1  ;;  %v153_v13 = vrot.slane %v152_v5, 1 }
  0x3b   :  { %v126_v8 = vadd.f32 %v125_v1, %v124_v57  ;;  %v160_v14 = vrot.slane %v159_v6, 1  ;;  %v236_v32 = vsub.s32 0, %v431_v4  ;;  %v240_v34 = vsub.s32 1, %v431_v4 }
  0x3c   :  { %v166_v15 = vadd.f32 %v165_v7, %v164_v63  ;;  %v140_v16 = vadd.f32 %v139_v10, %v138_v3  ;;  %v154_v18 = vadd.f32 %v153_v13, %v152_v5  ;;  %v244_v35 = vsub.s32 2, %v431_v4 }
  0x3d   :  { %v177_v17 = vcombine.low %v119_v0, %v126_v8  ;;  %v161_v19 = vadd.f32 %v160_v14, %v159_v6  ;;  %v248_v36 = vsub.s32 3, %v431_v4  ;;  %v252_v38 = vsub.s32 4, %v431_v4 }
  0x3e   :  { %v167_v20 = vrot.slane %v166_v15, 1  ;;  %v178_v21 = vcombine.low %v133_v9, %v140_v16  ;;  %v179_v25 = vcombine.low %v147_v12, %v154_v18  ;;  %v256_v39 = vsub.s32 5, %v431_v4 }
  0x3f   :  { %v187_v22 = vrot.slane %v177_v17, %v186_v11  ;;  %v260_v44 = vsub.s32 6, %v431_v4  ;;  %v264_v51 = vsub.s32 7, %v431_v4 }
  0x40   :  { %v168_v24 = vadd.f32 %v167_v20, %v166_v15  ;;  %v194_v26 = vrot.slane %v178_v21, %v186_v11  ;;  %v201_v28 = vrot.slane %v179_v25, %v186_v11 }
  0x42   :  { %v180_v27 = vcombine.low %v161_v19, %v168_v24  ;;  %v209_v29 = vcombine.low %v187_v22, %v194_v26 }
  0x44   :  { %v208_v30 = vrot.slane %v180_v27, %v186_v11  ;;  %v217_v23 = vrot.slane %v209_v29, %v186_v11 }
  0x46   :  { %v210_v31 = vcombine.low %v201_v28, %v208_v30 }
  0x48   :  { %v224_v33 = vrot.slane %v210_v31, %v186_v11 }
  0x4a   :  { %v225_v37 = vcombine.low %v217_v23, %v224_v33 }
  0x4c   :  { %v237_v40 = vrot.slane %v225_v37, %v236_v32  ;;  %v241_v41 = vrot.slane %v225_v37, %v240_v34  ;;  %v245_v42 = vrot.slane %v225_v37, %v244_v35  ;;  %v249_v43 = vrot.slane %v225_v37, %v248_v36 }
  0x4d   :  { %v253_v45 = vrot.slane %v225_v37, %v252_v38  ;;  %v257_v50 = vrot.slane %v225_v37, %v256_v39  ;;  %v261_v54 = vrot.slane %v225_v37, %v260_v44  ;;  %v265_v57 = vrot.slane %v225_v37, %v264_v51 }
  0x4e   :  { %v275_v46 = vsel %vm274_vm1, %v237_v40, 0.0  ;;  %v276_v47 = vsel %vm274_vm1, %v241_v41, 0.0  ;;  %v278_v48 = vsel %vm274_vm1, %v245_v42, 0.0  ;;  %v280_v52 = vsel %vm274_vm1, %v249_v43, 0.0 }
  0x4f   :  { %v277_v49 = vadd.f32 %v276_v47, %v275_v46  ;;  %v282_v55 = vsel %vm274_vm1, %v253_v45, 0.0  ;;  %v284_v58 = vsel %vm274_vm1, %v257_v50, 0.0  ;;  %v286_v60 = vsel %vm274_vm1, %v261_v54, 0.0 }
  0x50   :  { %v288_v62 = vsel %vm274_vm1, %v265_v57, 0.0 }
  0x51   :  { %v279_v53 = vadd.f32 %v278_v48, %v277_v49 }
  0x53   :  { %v281_v56 = vadd.f32 %v280_v52, %v279_v53 }
  0x55   :  { %v283_v59 = vadd.f32 %v282_v55, %v281_v56 }
  0x57   :  { %v285_v61 = vadd.f32 %v284_v58, %v283_v59 }
  0x59   :  { %v287_v63 = vadd.f32 %v286_v60, %v285_v61 }
  0x5b   :  { %v289_v0 = vadd.f32 %v288_v62, %v287_v63 }
  0x5d   :  { %290 = vadd.xlane.f32.xlu0 %v289_v0 }
  0xea   :  { %v291_v4 = vpop.xlane.xlu0 %290 }
  0xeb   :  { %v292_v1 = vrot.slane %v291_v4, 4 }
  0xed   :  { %v293_v2 = vadd.f32 %v292_v1, %v291_v4 }
  0xef   :  { %v294_v3 = vrot.slane %v293_v2, 2 }
  0xf1   :  { %v295_v5 = vadd.f32 %v294_v3, %v293_v2 }
  0xf3   :  { %v296_v6 = vrot.slane %v295_v5, 1 }
  0xf5   :  { %v297_v7 = vadd.f32 %v296_v6, %v295_v5 }
  0xf7   :  { %320 = vpush %v297_v7 }
 0x128   :  { %s321_s1 = spop %320 }
 0x129   :  { %300 = sst [smem:[#allocation8]] %s321_s1 }
 0x12a   :  { %380 = shalt.err (!%p377_p4)
}
 0x12b   :  { %s391_s11 = smov [#allocation8]  }
 0x12c   :  { %308 = dma.smem_to_hbm %s391_s11, 16, %s473_s2, [#allocation5]  }
 0x12d   :  { %385 = dma.done.wait [#allocation5], 16  }
 0x12e   :  { %386 = vsyncadd [#allocation5], 4294967280 }
 0x12f   :  { %312 = sfence }
 0x130   :  { %313 = vsyncpa [#allocation4], 1 }
 0x131   :  { %314 = vsyncpa [#allocation7], 1 }
 0x132   :  { %315 = vsyncpa [#allocation5], 1 }

</bundles_post_ra>
